<compile_context>
chip_gen: v7x
topology: tpu7x:2x2x1
jax: 0.10.0
libtpu: 0.0.40
codegen_flags: <defaults>
</compile_context>

<pallas_src>
import functools

import jax
import jax.numpy as jnp
from jax import lax
from jax.experimental import pallas as pl
from jax.experimental.pallas import tpu as pltpu


def _vmem_capacity_bytes() -> int:
    """Physical VMEM per TensorCore (v5e/v6e: 128 MiB, v7x: 64 MiB)."""
    try:
        info = pltpu.get_tpu_info()
        for name in ("vmem_capacity_bytes", "vmem_size_bytes", "vmem_bytes"):
            v = getattr(info, name, None)
            if v:
                return int(v)
    except Exception:
        pass
    return 64 * 1024 * 1024  # conservative fallback (v7x per-TC VMEM)


_VMEM_CAP = _vmem_capacity_bytes()


def _mean_edges_kernel(seg_ref, inv_ref, feat_ref, out_ref, *,
                       num_edges, tile_e, n_e_inner, needs_mask):
    """Grid = (edge_split, d_blocks, e_tiles); edge-tile axis innermost."""
    e = pl.program_id(2)

    @pl.when(e == 0)
    def _init():
        out_ref[...] = jnp.zeros_like(out_ref)

    g_pad = out_ref.shape[0]

    # Lane-dense ids (1, tile_e); transposed onehot (G_pad, tile_e) keeps the
    # MXU contraction dim last on the LHS (natural layout, no relayout) and
    # the compare/select work down to ~G_pad/8 sublanes of vregs.
    ids = seg_ref[...]                                        # (1, tile_e) int32
    g_iota = lax.broadcasted_iota(jnp.int32, (g_pad, tile_e), 0)
    onehot = (ids == g_iota).astype(feat_ref.dtype)           # (G_pad, tile_e)

    x = feat_ref[...]                                         # (tile_e, tile_d)
    if needs_mask:
        # Boundary tiles read past the (unpadded) end of feat in HBM; zero
        # those rows so garbage (possibly NaN) contributes nothing.
        tile_idx = pl.program_id(0) * n_e_inner + e
        row = tile_idx * tile_e + lax.broadcasted_iota(jnp.int32, (tile_e, 1), 0)
        x = jnp.where(row < num_edges, x, jnp.zeros_like(x))

    # out[g, d] += sum_e onehot[g, e] * feat[e, d]  — MXU matmul, f32
    # accumulation directly into the resident f32 output block (no scratch).
    out_ref[...] += lax.dot_general(
        onehot, x,
        dimension_numbers=(((1,), (0,)), ((), ())),
        preferred_element_type=jnp.float32)

    @pl.when(e == pl.num_programs(2) - 1)
    def _finalize():
        # inv_ref: (G_pad, 1) f32 reciprocal edge counts (0 for empty graphs).
        out_ref[...] = out_ref[...] * inv_ref[...]


@functools.partial(jax.jit,
                   static_argnames=("num_graphs", "tile_e", "tile_d_max",
                                    "num_edge_splits"))
def avg_pooling_edges(feat, edge_graph_ids, *, num_graphs,
                      tile_e=4096, tile_d_max=1024, num_edge_splits=2):
    """Per-graph mean of edge features (== dgl.mean_edges on a batched graph).

    feat:            [E, D] float edge features (all graphs concatenated).
    edge_graph_ids:  [E]   int, graph index (0..num_graphs-1) of each edge.
                     (Ids outside [0, num_graphs) are silently dropped.)
    returns:         [num_graphs, D] in feat.dtype
    """
    E, D = feat.shape
    G = int(num_graphs)
    out_dtype = feat.dtype
    if E == 0:
        return jnp.zeros((G, D), out_dtype)

    G_pad = max(8, pl.cdiv(G, 8) * 8)
    itemsize = jnp.dtype(feat.dtype).itemsize
    vmem_cap = _VMEM_CAP

    # ---- feature-axis tiling -------------------------------------------
    # D <= tile_d_max: use the full feature width as the block's last dim
    # (legal even when D % 128 != 0) -> no lane padding, no inflated HBM reads.
    # Only very wide features get blocked (tile_d a multiple of 256 for the
    # 256-wide v6e/v7x MXU; no collapse to 128).
    tile_d_max = max(256, (int(tile_d_max) // 256) * 256)
    if D <= tile_d_max:
        tile_d, D_pad = D, D
    else:
        tile_d = tile_d_max
        D_pad = pl.cdiv(D, tile_d) * tile_d
    n_d = D_pad // tile_d

    # ---- edge tiling -----------------------------------------------------
    # Big tiles amortize the ~0.35us per-grid-step cost against the feat DMA;
    # bounded so the double-buffered feat tile + onehot temporaries stay well
    # inside VMEM (v7x has only 64 MiB per TensorCore).
    feat_tile_budget = min(16 * 1024 * 1024, vmem_cap // 8)       # per buffer
    onehot_budget = 4 * 1024 * 1024
    tile_e = max(128, (int(tile_e) // 128) * 128)
    cap_feat = max(128, (feat_tile_budget // max(1, tile_d * itemsize)) // 128 * 128)
    cap_onehot = max(128, (onehot_budget // (G_pad * (8 + itemsize))) // 128 * 128)
    tile_e = min(tile_e, cap_feat, cap_onehot, pl.cdiv(E, 128) * 128)

    n_e_total = pl.cdiv(E, tile_e)

    # ---- split the edge axis for the second TensorCore (v7x megacore) -----
    # Only when the feature axis has a single block (otherwise the parallel d
    # axis already provides core-level parallelism).  Harmless on 1-TC chips.
    n_split = int(num_edge_splits)
    if n_d > 1 or n_split < 1 or n_e_total < n_split:
        n_split = 1
    n_e_inner = pl.cdiv(n_e_total, n_split)
    E_grid = n_split * n_e_inner * tile_e       # edge extent covered by the grid

    # ---- inputs ------------------------------------------------------------
    # Only the tiny id vector is ever padded along E.  The big feature matrix
    # is NOT copied/padded along E unless it is tiny (<= 1 MiB, where a pad is
    # free); boundary tiles are masked inside the kernel instead.
    ids = edge_graph_ids.astype(jnp.int32)
    seg = ids if E_grid == E else jnp.pad(ids, (0, E_grid - E),
                                          constant_values=G_pad)
    seg = seg.reshape(1, E_grid)

    small = E * max(D, 1) * itemsize <= (1 << 20)
    pad_rows = (E_grid - E) if (small and E_grid != E) else 0
    pad_cols = D_pad - D
    feat_p = feat
    if pad_rows or pad_cols:
        feat_p = jnp.pad(feat, ((0, pad_rows), (0, pad_cols)))
    feat_rows = E + pad_rows
    needs_mask = E_grid > feat_rows

    # ---- per-graph reciprocal edge counts (tiny O(E) precompute) ----------
    cnt = jax.ops.segment_sum(jnp.ones((E,), jnp.float32), ids,
                              num_segments=G_pad)
    inv = jnp.where(cnt > 0, 1.0 / jnp.maximum(cnt, 1.0), 0.0).reshape(G_pad, 1)

    # ---- index maps --------------------------------------------------------
    n_e_feat = pl.cdiv(feat_rows, tile_e)
    if n_split * n_e_inner > n_e_feat:
        # Grid tiles fully past the end of feat: clamp to the last real block;
        # the in-kernel row mask zeroes their contribution.
        def feat_map(s, d, e):
            return (jnp.minimum(s * n_e_inner + e, n_e_feat - 1), d)
    else:
        def feat_map(s, d, e):
            return (s * n_e_inner + e, d)

    kernel = functools.partial(
        _mean_edges_kernel, num_edges=E, tile_e=tile_e,
        n_e_inner=n_e_inner, needs_mask=needs_mask)

    # ---- explicit VMEM budget (leave headroom; cap at 75% of physical) -----
    need = (2 * tile_e * tile_d * itemsize          # feat tile, double-buffered
            + 2 * 8 * tile_e * 4                    # ids block (sublane-padded)
            + 2 * G_pad * 128 * 4                   # 1/count block (lane-padded)
            + 2 * G_pad * tile_d * 4                # resident f32 output block
            + G_pad * tile_e * (8 + itemsize)       # iota/compare/onehot temps
            + (tile_e * tile_d * itemsize if needs_mask else 0))
    vmem_limit = int(min(max(vmem_cap * 3 // 4, 32 * 1024 * 1024),
                         max(32 * 1024 * 1024, 2 * need)))

    out_padded = pl.pallas_call(
        kernel,
        out_shape=jax.ShapeDtypeStruct((n_split * G_pad, D_pad), jnp.float32),
        grid_spec=pltpu.PrefetchScalarGridSpec(
            num_scalar_prefetch=0,
            grid=(n_split, n_d, n_e_inner),
            in_specs=[
                pl.BlockSpec((1, tile_e),
                             lambda s, d, e: (0, s * n_e_inner + e)),   # ids
                pl.BlockSpec((G_pad, 1), lambda s, d, e: (0, 0)),       # 1/count
                pl.BlockSpec((tile_e, tile_d), feat_map),               # features
            ],
            out_specs=pl.BlockSpec((G_pad, tile_d), lambda s, d, e: (s, d)),
        ),
        compiler_params=pltpu.CompilerParams(
            dimension_semantics=("parallel", "parallel", "arbitrary"),
            vmem_limit_bytes=vmem_limit),
    )(seg, inv, feat_p)

    # Combine per-core partial means (mean is linear in the per-edge sum, so
    # summing inv-scaled partials is exact) and cast to the input dtype.
    out = out_padded.reshape(n_split, G_pad, D_pad).sum(axis=0)
    return out[:G, :D].astype(out_dtype)


if __name__ == "__main__":
    key = jax.random.PRNGKey(0)
    k1, k2, k3 = jax.random.split(key, 3)

    def ref_mean_edges(f, ids, g):
        s = jax.ops.segment_sum(f.astype(jnp.float32), ids, num_segments=g)
        c = jax.ops.segment_sum(jnp.ones((f.shape[0], 1), jnp.float32), ids,
                                num_segments=g)
        return jnp.where(c > 0, s / jnp.maximum(c, 1.0), 0.0)

    # --- Test 1: 4 graphs with 10, 6, 0, 8 edges (one empty graph), D=32 ----
    edges_per_graph = [10, 6, 0, 8]
    G1 = len(edges_per_graph)
    D1 = 32
    E1 = sum(edges_per_graph)
    feat1 = jax.random.normal(k1, (E1, D1), dtype=jnp.float32)
    ids1 = jnp.concatenate(
        [jnp.full((n,), g, dtype=jnp.int32) for g, n in enumerate(edges_per_graph)])

    out1 = jax.block_until_ready(avg_pooling_edges(feat1, ids1, num_graphs=G1))
    ref1 = ref_mean_edges(feat1, ids1, G1)
    assert out1.shape == (G1, D1)
    assert jnp.allclose(out1, ref1, atol=1e-5, rtol=1e-5)

    # bfloat16 path (native MXU dtype; accumulation stays f32 inside the kernel)
    feat1_bf16 = feat1.astype(jnp.bfloat16)
    out1_bf16 = jax.block_until_ready(
        avg_pooling_edges(feat1_bf16, ids1, num_graphs=G1))
    ref1_bf16 = ref_mean_edges(feat1_bf16, ids1, G1)
    assert out1_bf16.dtype == jnp.bfloat16
    assert jnp.allclose(out1_bf16.astype(jnp.float32), ref1_bf16,
                        atol=2e-2, rtol=2e-2)

    # --- Test 2: multiple edge tiles + edge-axis core split, unsorted ids ---
    E2, D2, G2 = 700, 256, 6
    feat2 = jax.random.normal(k2, (E2, D2), dtype=jnp.float32)
    ids2 = jax.random.randint(k3, (E2,), 0, G2, dtype=jnp.int32)
    out2 = jax.block_until_ready(
        avg_pooling_edges(feat2, ids2, num_graphs=G2, tile_e=256))
    ref2 = ref_mean_edges(feat2, ids2, G2)
    assert out2.shape == (G2, D2)
    assert jnp.allclose(out2, ref2, atol=1e-4, rtol=1e-4)

    print("KERNEL_OK")
</pallas_src>

<mosaic_0001>
module attributes {stable_mosaic.version = 11 : i64} {
  func.func @_mean_edges_kernel(%arg0: i32, %arg1: i32, %arg2: i32, %arg3: memref<1x128xi32, #tpu.memory_space<vmem>>, %arg4: memref<8x1xf32, #tpu.memory_space<vmem>>, %arg5: memref<128x32xf32, #tpu.memory_space<vmem>>, %arg6: memref<8x32xf32, #tpu.memory_space<vmem>>) attributes {dimension_semantics = [#tpu.dimension_semantics<parallel>, #tpu.dimension_semantics<parallel>, #tpu.dimension_semantics<arbitrary>], iteration_bounds = array<i64: 1, 1, 1>, scalar_prefetch = 0 : i64, scratch_operands = 0 : i64, tpu.core_type = #tpu.core_type<tc>, window_params = [{transform_indices = @transform_0, window_bounds = array<i64: 1, 128>}, {pipeline_mode = #tpu.pipeline_mode<synchronous>, transform_indices = @transform_1, window_bounds = array<i64: 8, 1>}, {transform_indices = @transform_2, window_bounds = array<i64: 128, 32>}, {transform_indices = @transform_3, window_bounds = array<i64: 8, 32>}]} {
    %c0_i32 = arith.constant 0 : i32
    %0 = arith.cmpi eq, %arg2, %c0_i32 : i32
    %1 = arith.extui %0 : i1 to i32
    %c0_i32_0 = arith.constant 0 : i32
    %2 = arith.cmpi ne, %1, %c0_i32_0 : i32
    scf.if %2 {
      %cst_10 = arith.constant 0.000000e+00 : f32
      %17 = vector.broadcast %cst_10 : f32 to vector<8x32xf32>
      %c0_11 = arith.constant 0 : index
      %c0_12 = arith.constant 0 : index
      %18 = vector.load %arg6[%c0_11, %c0_12] : memref<8x32xf32, #tpu.memory_space<vmem>>, vector<8x32xf32>
      tpu.vector_store %arg6[%c0_11, %c0_12], %17 {strides = array<i32>} : memref<8x32xf32, #tpu.memory_space<vmem>>, vector<8x32xf32>,
    } else {
    }
    %c0 = arith.constant 0 : index
    %c0_1 = arith.constant 0 : index
    %3 = vector.load %arg3[%c0, %c0_1] : memref<1x128xi32, #tpu.memory_space<vmem>>, vector<1x128xi32>
    %4 = tpu.iota {dimensions = array<i32: 0>} : vector<8x128xi32>
    %5 = vector.broadcast %3 : vector<1x128xi32> to vector<8x128xi32>
    %6 = arith.cmpi eq, %5, %4 : vector<8x128xi32>
    %7 = arith.extui %6 : vector<8x128xi1> to vector<8x128xi32>
    %8 = arith.sitofp %7 : vector<8x128xi32> to vector<8x128xf32>
    %c0_2 = arith.constant 0 : index
    %c0_3 = arith.constant 0 : index
    %9 = vector.load %arg5[%c0_2, %c0_3] : memref<128x32xf32, #tpu.memory_space<vmem>>, vector<128x32xf32>
    %c0_4 = arith.constant 0 : index
    %c0_5 = arith.constant 0 : index
    %10 = vector.load %arg6[%c0_4, %c0_5] : memref<8x32xf32, #tpu.memory_space<vmem>>, vector<8x32xf32>
    %cst = arith.constant dense<0.000000e+00> : vector<8x32xf32>
    %11 = tpu.matmul %8, %9, %cst {dimension_numbers = #tpu.dot_dimension_numbers<[1], [0], [0], [1], [0, 0, 1, 1], [], []>} : vector<8x128xf32>, vector<128x32xf32>, vector<8x32xf32> -> vector<8x32xf32>
    %12 = arith.addf %10, %11 : vector<8x32xf32>
    %c0_6 = arith.constant 0 : index
    %c0_7 = arith.constant 0 : index
    %13 = vector.load %arg6[%c0_6, %c0_7] : memref<8x32xf32, #tpu.memory_space<vmem>>, vector<8x32xf32>
    tpu.vector_store %arg6[%c0_6, %c0_7], %12 {strides = array<i32>} : memref<8x32xf32, #tpu.memory_space<vmem>>, vector<8x32xf32>,
    %c0_i32_8 = arith.constant 0 : i32
    %14 = arith.cmpi eq, %arg2, %c0_i32_8 : i32
    %15 = arith.extui %14 : i1 to i32
    %c0_i32_9 = arith.constant 0 : i32
    %16 = arith.cmpi ne, %15, %c0_i32_9 : i32
    scf.if %16 {
      %c0_10 = arith.constant 0 : index
      %c0_11 = arith.constant 0 : index
      %17 = vector.load %arg6[%c0_10, %c0_11] : memref<8x32xf32, #tpu.memory_space<vmem>>, vector<8x32xf32>
      %c0_12 = arith.constant 0 : index
      %c0_13 = arith.constant 0 : index
      %18 = vector.load %arg4[%c0_12, %c0_13] : memref<8x1xf32, #tpu.memory_space<vmem>>, vector<8x1xf32>
      %19 = vector.broadcast %18 : vector<8x1xf32> to vector<8x32xf32>
      %20 = arith.mulf %17, %19 : vector<8x32xf32>
      %c0_14 = arith.constant 0 : index
      %c0_15 = arith.constant 0 : index
      %21 = vector.load %arg6[%c0_14, %c0_15] : memref<8x32xf32, #tpu.memory_space<vmem>>, vector<8x32xf32>
      tpu.vector_store %arg6[%c0_14, %c0_15], %20 {strides = array<i32>} : memref<8x32xf32, #tpu.memory_space<vmem>>, vector<8x32xf32>,
    } else {
    }
    return
  }
  func.func @transform_0(%arg0: i32, %arg1: i32, %arg2: i32) -> (i32, i32) {
    %c1_i32 = arith.constant 1 : i32
    %0 = arith.muli %arg0, %c1_i32 : i32
    %1 = arith.addi %0, %arg2 : i32
    %c0_i32 = arith.constant 0 : i32
    %c0_i32_0 = arith.constant 0 : i32
    return %c0_i32, %1 : i32, i32
  }
  func.func @transform_1(%arg0: i32, %arg1: i32, %arg2: i32) -> (i32, i32) {
    %c0_i32 = arith.constant 0 : i32
    %c0_i32_0 = arith.constant 0 : i32
    %c0_i32_1 = arith.constant 0 : i32
    return %c0_i32, %c0_i32_0 : i32, i32
  }
  func.func @transform_2(%arg0: i32, %arg1: i32, %arg2: i32) -> (i32, i32) {
    %c1_i32 = arith.constant 1 : i32
    %0 = arith.muli %arg0, %c1_i32 : i32
    %1 = arith.addi %0, %arg2 : i32
    %c0_i32 = arith.constant 0 : i32
    return %1, %arg1 : i32, i32
  }
  func.func @transform_3(%arg0: i32, %arg1: i32, %arg2: i32) -> (i32, i32) {
    %c0_i32 = arith.constant 0 : i32
    return %arg0, %arg1 : i32, i32
  }
}

</mosaic_0001>

<bundles_post_ra>
// kernel: avg_pooling_edges.1
= control target key start
LH: loop header
LB: loop body
LE: loop exit
PB: predicated region body
PF: predicated region fallthrough
CT: control target
= control target key end

     0   :  { %vm54_vm0 = vcmask 261120   ;;  %v266_v0 = vmov 0.0|0.0   ;;  %v267_v4 = vmov 0.0   ;;  %vm268_vm1 = vmmov 0   ;;  %s363_s2 = inlined_call_operand.vmem [shape: f32[128,32], index: 2, kind: input, shape index: {}]   ;;  %s364_s3 = inlined_call_operand.vmem [shape: f32[8,32], index: 3, kind: output, shape index: {}]   ;;  %s365_s1 = inlined_call_operand.vmem [shape: f32[8,1], index: 1, kind: input, shape index: {}]   ;;  %s366_s0 = inlined_call_operand.vmem [shape: s32[1,128], index: 0, kind: input, shape index: {}]  }
   0x1   :  { %236 = vmatprep.subr.bf16.mxu0 %v266_v0  ;;  %v66_v1 = vld [vmem:[%s363_s2] sm:$0xff]  ;;  %v67_v2 = vld [vmem:[%s363_s2 + $0x8] sm:$0xff]  ;;  %v68_v3 = vld [vmem:[%s363_s2 + $0x10] sm:$0xff]  ;;  %55 = vst.msk [vmem:[%s364_s3] sm:$0xff] %vm54_vm0, %v267_v4  ;;  %233 = vmatprep.mubr.msk.f32.mxu0 %vm268_vm1, %v267_v4  ;;  %v269_v7 = vmov 0   ;;  %v57_v25 = vlaneseq  ;;  %v270_v31 = vmov 1.0  }
   0x2   :  { %v237_v5 = vpack.c.bf16 %v67_v2, %v66_v1  ;;  %v69_v6 = vld [vmem:[%s363_s2 + $0x18] sm:$0xff]  ;;  %265 = vset.pattern.permute.xlu0 %v269_v7  ;;  %v70_v9 = vld [vmem:[%s363_s2 + $0x20] sm:$0xff]  ;;  %v71_v10 = vld [vmem:[%s363_s2 + $0x28] sm:$0xff] }
   0x3   :  { %v240_v8 = vpack.c.bf16 %v69_v6, %v68_v3  ;;  %v160_v11 = vld [vmem:[%s365_s1] sm:$0xff]  ;;  %v243_v12 = vpack.c.bf16 %v71_v10, %v70_v9  ;;  %v72_v13 = vld [vmem:[%s363_s2 + $0x30] sm:$0xff]  ;;  %v73_v14 = vld [vmem:[%s363_s2 + $0x38] sm:$0xff]  ;;  %v58_v29 = vshrl.u32 %v57_v25, 7 }
   0x4   :  { %238 = vmatpush3.bf16.msra.mxu0 %v237_v5  ;;  %163 = vperm.xlu0 %265, %v160_v11   ;;  %v246_v15 = vpack.c.bf16 %v73_v14, %v72_v13  ;;  %v74_v16 = vld [vmem:[%s363_s2 + $0x40] sm:$0xff]  ;;  %v75_v17 = vld [vmem:[%s363_s2 + $0x48] sm:$0xff]  ;;  %v76_v19 = vld [vmem:[%s363_s2 + $0x50] sm:$0xff] }
   0x5   :  { %239 = vmatprep.subr.bf16.mxu0 %v266_v0  ;;  %v249_v18 = vpack.c.bf16 %v75_v17, %v74_v16  ;;  %v77_v20 = vld [vmem:[%s363_s2 + $0x58] sm:$0xff]  ;;  %v78_v22 = vld [vmem:[%s363_s2 + $0x60] sm:$0xff]  ;;  %v79_v23 = vld [vmem:[%s363_s2 + $0x68] sm:$0xff] }
   0x6   :  { %v252_v21 = vpack.c.bf16 %v77_v20, %v76_v19  ;;  %v255_v24 = vpack.c.bf16 %v79_v23, %v78_v22  ;;  %v80_v26 = vld [vmem:[%s363_s2 + $0x70] sm:$0xff]  ;;  %v81_v27 = vld [vmem:[%s363_s2 + $0x78] sm:$0xff]  ;;  %v181_v30 = vld [vmem:[%s366_s0] ss:$0 sm:$0xff] }
   0x7   :  { %v258_v28 = vpack.c.bf16 %v81_v27, %v80_v26  ;;  %vm63_vm2 = vcmp.eq.s32.totalorder %v181_v30, %v58_v29 }
   0x8   :  { %241 = vmatpush3.bf16.msra.mxu0 %v240_v8  ;;  %v82_v32 = vld [vmem:[%s364_s3] sm:$0xff] }
   0x9   :  { %242 = vmatprep.subr.bf16.mxu0 %v266_v0 }
   0xc   :  { %244 = vmatpush3.bf16.msra.mxu0 %v243_v12 }
   0xd   :  { %245 = vmatprep.subr.bf16.mxu0 %v266_v0 }
  0x10   :  { %247 = vmatpush3.bf16.msra.mxu0 %v246_v15 }
  0x11   :  { %248 = vmatprep.subr.bf16.mxu0 %v266_v0 }
  0x14   :  { %250 = vmatpush3.bf16.msra.mxu0 %v249_v18 }
  0x15   :  { %251 = vmatprep.subr.bf16.mxu0 %v266_v0 }
  0x18   :  { %253 = vmatpush3.bf16.msra.mxu0 %v252_v21 }
  0x19   :  { %254 = vmatprep.subr.bf16.mxu0 %v266_v0 }
  0x1c   :  { %256 = vmatpush3.bf16.msra.mxu0 %v255_v24 }
  0x1d   :  { %257 = vmatprep.subr.bf16.mxu0 %v266_v0 }
  0x20   :  { %259 = vmatpush3.bf16.msra.mxu0 %v258_v28 }
  0x23   :  { %234 = vmatmul.mubr.msk.f32.vlgmr.msra.gmra.mrb[0].mxu0 %vm63_vm2, %v270_v31 }
  0x83   :  { %v164_v36 = vpop.permute.xlu0 %163 }
  0xf6   :  { %v149_v33 = vpop.f32.mrb[0].mxu0 }
  0xf7   :  { %v153_v34 = vadd.f32 %v149_v33, %v82_v32  ;;  %v235_v35 = vpop.f32.mrb[1].mxu0 }
  0xf9   :  { %155 = vst.msk [vmem:[%s364_s3] sm:$0xff] %vm54_vm0, %v153_v34 }
 0x100   :  { %v159_v37 = vld [vmem:[%s364_s3] sm:$0xff] }
 0x101   :  { %v166_v38 = vmul.f32 %v164_v36, %v159_v37 }
 0x103   :  { %167 = vst.msk [vmem:[%s364_s3] sm:$0xff] %vm54_vm0, %v166_v38 }

</bundles_post_ra>
